<compile_context>
chip_gen: v6e
topology: v6e:2x2x1
jax: 0.10.0
libtpu: 0.0.40
codegen_flags: <defaults>
</compile_context>

<pallas_src>
import functools

import jax
import jax.numpy as jnp
from jax.experimental import pallas as pl
from jax.experimental.pallas import tpu as pltpu


def _round_up(x: int, m: int) -> int:
    return (x + m - 1) // m * m


# --------------------------------------------------------------------------
# Pass 1: row-wise L2 normalization (torch F.normalize, eps=1e-12), fold in
# 1/sqrt(temperature) so (fs @ fs.T) == (fn @ fn.T) / temperature, cast bf16.
# --------------------------------------------------------------------------
def _normalize_scale_kernel(feat_ref, out_ref, *, inv_sqrt_temp):
    f = feat_ref[...].astype(jnp.float32)
    sumsq = jnp.sum(f * f, axis=-1, keepdims=True)
    # x * rsqrt(max(sumsq, eps^2)) == x / max(||x||, eps); rsqrt -> EUP.
    inv = jax.lax.rsqrt(jnp.maximum(sumsq, jnp.float32(1e-24)))
    out_ref[...] = (f * (inv * jnp.float32(inv_sqrt_temp))).astype(out_ref.dtype)


# --------------------------------------------------------------------------
# Pass 2: tiled online-softmax supervised contrastive loss.
# --------------------------------------------------------------------------
def _supcon_tile_kernel(fs_row_ref, fs_col_ref, lab_row_ref, lab_col_ref,
                        out_ref, m_sc, z_sc, wsum_sc, wdot_sc,
                        *, tile, diag_offset, n_valid, padded_cols):
    i = pl.program_id(0)   # row tile  ("parallel")
    j = pl.program_id(1)   # col tile  ("arbitrary", innermost reduction)

    @pl.when(j == 0)
    def _init():
        m_sc[...] = jnp.full(m_sc.shape, -jnp.inf, jnp.float32)
        z_sc[...] = jnp.zeros(z_sc.shape, jnp.float32)
        wsum_sc[...] = jnp.zeros(wsum_sc.shape, jnp.float32)
        wdot_sc[...] = jnp.zeros(wdot_sc.shape, jnp.float32)

    # (tile, tile) logits: bf16 MXU inputs, f32 accumulation.
    # 1/temperature is already folded into both operands (1/sqrt(T) each).
    logits = jax.lax.dot_general(
        fs_row_ref[...], fs_col_ref[...],
        (((1,), (1,)), ((), ())),
        preferred_element_type=jnp.float32)

    # Anchor (self-similarity) column of row r: global_col == global_row + off
    #   <=>  local_col == local_row + (i*tile + diag_offset - j*tile).
    col_ids = jax.lax.broadcasted_iota(jnp.int32, (tile, tile), 1)
    row_ids = jax.lax.broadcasted_iota(jnp.int32, (tile, 1), 0)
    diag = col_ids == row_ids + (i * tile + diag_offset - j * tile)
    logits = jnp.where(diag, jnp.float32(-1e30), logits)
    if padded_cols:  # only traced when B was padded up to the tile size
        logits = jnp.where(col_ids + j * tile >= n_valid,
                           jnp.float32(-1e30), logits)

    # positives mask: same label, anchor column removed.
    pos = jnp.where(diag, jnp.float32(0.0),
                    (lab_row_ref[...] == lab_col_ref[...]).astype(jnp.float32))

    # online softmax accumulation (per row of this row tile)
    tile_max = jnp.max(logits, axis=-1, keepdims=True)
    m_old = m_sc[...]
    m_new = jnp.maximum(m_old, tile_max)
    z_sc[...] = (z_sc[...] * jnp.exp(m_old - m_new)
                 + jnp.sum(jnp.exp(logits - m_new), axis=-1, keepdims=True))
    m_sc[...] = m_new
    wsum_sc[...] = wsum_sc[...] + jnp.sum(pos, axis=-1, keepdims=True)
    wdot_sc[...] = wdot_sc[...] + jnp.sum(pos * logits, axis=-1, keepdims=True)

    @pl.when(j == pl.num_programs(1) - 1)
    def _finalize():
        lse = m_sc[...] + jnp.log(z_sc[...])
        wsum = wsum_sc[...]
        denom = jnp.maximum(wsum, jnp.float32(1.0))
        # -sum_c (pos_c / denom) * (logit_c - lse) == -(wdot - wsum*lse)/denom
        out_ref[...] = -(wdot_sc[...] - wsum * lse) / denom


def supcon_loss(features, labels, *, temperature=0.07, device_rank=0,
                block_size=128):
    """features: [B, D] float, labels: [B] int. Returns scalar float32 loss.

    block_size: row/col tile edge. 128 is safe everywhere; 256 can be used
    on v6e/v7x (2x256^2 MXU) for large B.
    """
    B, D = features.shape
    tile = block_size
    B_pad = _round_up(B, tile)
    D_pad = _round_up(max(D, 128), 128)   # full contraction lane for the MXU

    feat = jnp.pad(features.astype(jnp.float32),
                   ((0, B_pad - B), (0, D_pad - D)))
    lab = jnp.pad(labels.astype(jnp.int32), (0, B_pad - B),
                  constant_values=jnp.iinfo(jnp.int32).min)

    # ---- pass 1: normalize + fold 1/sqrt(T) + cast bf16 -------------------
    norm_kernel = functools.partial(
        _normalize_scale_kernel,
        inv_sqrt_temp=float(1.0 / (float(temperature) ** 0.5)))
    fs = pl.pallas_call(
        norm_kernel,
        out_shape=jax.ShapeDtypeStruct((B_pad, D_pad), jnp.bfloat16),
        grid=(B_pad // tile,),
        in_specs=[pl.BlockSpec((tile, D_pad), lambda i: (i, 0))],
        out_specs=pl.BlockSpec((tile, D_pad), lambda i: (i, 0)),
        compiler_params=pltpu.CompilerParams(
            dimension_semantics=("parallel",)),
    )(feat)

    lab_row = lab.reshape(B_pad, 1)     # sublane-shaped but tiny (tile x 1)
    lab_col = lab.reshape(1, B_pad)     # lane-dense

    n_row_tiles = B_pad // tile
    n_col_tiles = B_pad // tile

    kernel = functools.partial(
        _supcon_tile_kernel,
        tile=tile,
        diag_offset=B * device_rank,    # row-index offset of the anchor column
        n_valid=B,
        padded_cols=(B_pad != B))

    cost = pl.CostEstimate(
        flops=2 * B_pad * B_pad * D_pad,
        transcendentals=B_pad * B_pad,
        bytes_accessed=(B_pad * D_pad * 2 * (1 + n_row_tiles)  # bf16 features
                        + 3 * B_pad * 4))                      # labels + output

    per_row = pl.pallas_call(
        kernel,
        out_shape=jax.ShapeDtypeStruct((B_pad, 1), jnp.float32),
        grid=(n_row_tiles, n_col_tiles),
        in_specs=[
            pl.BlockSpec((tile, D_pad), lambda i, j: (i, 0)),  # row features
            pl.BlockSpec((tile, D_pad), lambda i, j: (j, 0)),  # col features
            pl.BlockSpec((tile, 1), lambda i, j: (i, 0)),      # row labels
            pl.BlockSpec((1, tile), lambda i, j: (0, j)),      # col labels
        ],
        out_specs=pl.BlockSpec((tile, 1), lambda i, j: (i, 0)),
        scratch_shapes=[pltpu.VMEM((tile, 1), jnp.float32)] * 4,
        compiler_params=pltpu.CompilerParams(
            dimension_semantics=("parallel", "arbitrary"),
            vmem_limit_bytes=32 * 1024 * 1024),
        cost_estimate=cost,
    )(fs, fs, lab_row, lab_col)

    # per_row already holds the (negated) per-row cross-entropy; mean over the
    # real (unpadded) rows. O(B) reduction, trivial in XLA.
    return jnp.sum(per_row[:B, 0]) / jnp.float32(B)


# --------------------------------------------------------------------------
# Pure-JAX f32 reference mirroring the PyTorch module (single device).
# --------------------------------------------------------------------------
def _supcon_ref(features, labels, *, temperature=0.07):
    B = features.shape[0]
    f = features / jnp.maximum(
        jnp.linalg.norm(features, axis=-1, keepdims=True), 1e-12)
    mask = (labels[:, None] == labels[None, :]).astype(jnp.float32)
    anchor = 1.0 - jnp.eye(B, dtype=jnp.float32)   # device_rank = 0
    mask = mask * anchor
    logits = (f @ f.T) / temperature
    logits = logits - (1.0 - anchor) * jnp.finfo(jnp.float32).max
    logits = logits - jnp.max(logits, axis=-1, keepdims=True)
    mask = mask / jnp.maximum(jnp.sum(mask, axis=-1, keepdims=True), 1.0)
    log_probs = jax.nn.log_softmax(logits, axis=-1)
    return -jnp.mean(jnp.sum(mask * log_probs, axis=-1))


if __name__ == "__main__":
    key = jax.random.PRNGKey(0)
    k1, k2, k3, k4 = jax.random.split(key, 4)

    # Case 1: exercises the 2x2 tile grid, online softmax across col tiles,
    # and feature-dim padding (96 -> 128).
    B1, D1 = 256, 96
    feats1 = jax.random.normal(k1, (B1, D1), dtype=jnp.float32)
    labels1 = jax.random.randint(k2, (B1,), 0, 8, dtype=jnp.int32)
    loss1 = jax.block_until_ready(supcon_loss(feats1, labels1, temperature=0.07))
    ref1 = _supcon_ref(feats1, labels1, temperature=0.07)
    assert jnp.allclose(loss1, ref1, atol=5e-2, rtol=5e-2), (loss1, ref1)

    # Case 2: odd (small) shapes -> row / col / feature padding paths.
    B2, D2 = 24, 48
    feats2 = jax.random.normal(k3, (B2, D2), dtype=jnp.float32)
    labels2 = jax.random.randint(k4, (B2,), 0, 4, dtype=jnp.int32)
    loss2 = jax.block_until_ready(supcon_loss(feats2, labels2, temperature=0.07))
    ref2 = _supcon_ref(feats2, labels2, temperature=0.07)
    assert jnp.allclose(loss2, ref2, atol=5e-2, rtol=5e-2), (loss2, ref2)

    print("KERNEL_OK")
</pallas_src>

<mosaic_0001>
module attributes {stable_mosaic.version = 11 : i64} {
  func.func @_normalize_scale_kernel(%arg0: i32, %arg1: memref<128x128xf32, #tpu.memory_space<vmem>>, %arg2: memref<128x128xbf16, #tpu.memory_space<vmem>>) attributes {dimension_semantics = [#tpu.dimension_semantics<parallel>], iteration_bounds = array<i64: 2>, scalar_prefetch = 0 : i64, scratch_operands = 0 : i64, tpu.core_type = #tpu.core_type<tc>, window_params = [{transform_indices = @transform_0, window_bounds = array<i64: 128, 128>}, {transform_indices = @transform_1, window_bounds = array<i64: 128, 128>}]} {
    %c0 = arith.constant 0 : index
    %c0_0 = arith.constant 0 : index
    %0 = vector.load %arg1[%c0, %c0_0] : memref<128x128xf32, #tpu.memory_space<vmem>>, vector<128x128xf32>
    %1 = arith.mulf %0, %0 : vector<128x128xf32>
    %cst = arith.constant dense<0.000000e+00> : vector<128xf32>
    %2 = vector.multi_reduction <add>, %1, %cst [1] : vector<128x128xf32> to vector<128xf32>
    %3 = vector.shape_cast %2 : vector<128xf32> to vector<128x1xf32>
    %cst_1 = arith.constant 1.000000e-24 : f32
    %4 = vector.broadcast %cst_1 : f32 to vector<128x1xf32>
    %5 = arith.maximumf %3, %4 : vector<128x1xf32>
    %6 = math.rsqrt %5 : vector<128x1xf32>
    %cst_2 = arith.constant 3.77964473 : f32
    %7 = vector.broadcast %cst_2 : f32 to vector<128x1xf32>
    %8 = arith.mulf %6, %7 : vector<128x1xf32>
    %9 = vector.broadcast %8 : vector<128x1xf32> to vector<128x128xf32>
    %10 = arith.mulf %0, %9 : vector<128x128xf32>
    %11 = arith.truncf %10 : vector<128x128xf32> to vector<128x128xbf16>
    %c0_3 = arith.constant 0 : index
    %c0_4 = arith.constant 0 : index
    %12 = vector.load %arg2[%c0_3, %c0_4] : memref<128x128xbf16, #tpu.memory_space<vmem>>, vector<128x128xbf16>
    tpu.vector_store %arg2[%c0_3, %c0_4], %11 {strides = array<i32>} : memref<128x128xbf16, #tpu.memory_space<vmem>>, vector<128x128xbf16>,
    return
  }
  func.func @transform_0(%arg0: i32) -> (i32, i32) {
    %c0_i32 = arith.constant 0 : i32
    %c0_i32_0 = arith.constant 0 : i32
    return %arg0, %c0_i32 : i32, i32
  }
  func.func @transform_1(%arg0: i32) -> (i32, i32) {
    %c0_i32 = arith.constant 0 : i32
    %c0_i32_0 = arith.constant 0 : i32
    return %arg0, %c0_i32 : i32, i32
  }
}

</mosaic_0001>

<bundles_post_ra>
// kernel: tpu_custom_call.1
= control target key start
LH: loop header
LB: loop body
LE: loop exit
PB: predicated region body
PF: predicated region fallthrough
CT: control target
= control target key end

     0   :  { %6 = vsyncpa [#allocation3], 0  ;;  %s983_s0 = inlined_call_operand.hbm [shape: f32[256,128], index: 0, kind: input, shape index: {}]   ;;  %s984_s1 = inlined_call_operand.hbm [shape: bf16[256,128], index: 1, kind: output, shape index: {}]  }
   0x1   :  { %8 = vsyncpa [#allocation3 + $0x1], 0 }
   0x2   :  { %9 = vsyncpa [#allocation4], 0 }
   0x3   :  { %11 = vsyncpa [#allocation4 + $0x1], 0  ;;  %s719_s6 = smov 0   ;;  %s721_s7 = smov 0  }
   0x4   :  { %s723_s8 = smov 0   ;;  %s725_s9 = smov 0  }
   0x5 LB: > { %s740_s10 = sadd.s32 4294967295, %s701_s9   ;;  %s432_s11 = sadd.s32 4294967294, %s701_s9   ;;  %s701_s9 = sphi %s725_s9, %s999_s9   ;;  %s697_s8 = sphi %s723_s8, %s998_s8   ;;  %s693_s7 = sphi %s721_s7, %s997_s7   ;;  %s689_s6 = sphi %s719_s6, %s996_s6  }
   0x6   : > { %s744_s12 = sadd.s32 1, %s701_s9   ;;  %s24_s13 = sadd.s32 1, %s697_s8 }
   0x7   : > { %s21_s14 = ssub.s32 %s701_s9, %s744_s12  ;;  %p31_p0 = scmp.ne.s32.totalorder %s697_s8, %s693_s7 }
   0x8   : > { %p22_p1 = scmp.eq.s32.totalorder %s21_s14, 0  ;;  %p32_p2 = scmp.eq.s32.totalorder %s701_s9, 0 }
   0x9   : > { %p37_p3 = scmp.ne.s32.totalorder %s693_s7, %s689_s6  ;;  %p38_p4 = scmp.eq.s32.totalorder %s740_s10, 0 }
   0xa   : > { %s756_s15 = scalar_select %p22_p1, %s697_s8, %s24_s13  }
   0xb   : > { %p758_p5 = por %p32_p2, %p31_p0  ;;  %p762_p6 = por %p38_p4, %p37_p3 }
   0xc   : > { %p61_p7 = scmp.eq.s32.totalorder %s740_s10, 1  ;;  %p67_p8 = scmp.eq.s32.totalorder %s432_s11, 1 }
   0xd   : > { %s988_s17 = scalar_select %p762_p6, 1, 0 }
   0xe   : > { %p539_p10 = scmp.lt.s32.totalorder %s701_s9, 2  ;;  %p769_p11 = por %p61_p7, %p31_p0 }
   0xf   : > { %p773_p12 = por %p67_p8, %p37_p3  ;;  %s87_s20 = sand.u32 1, %s697_s8  }
  0x10   : > { %s989_s18 = scalar_select %p769_p11, 1, 0 }
  0x11   : > { %s990_s19 = scalar_select %p773_p12, 1, 0 }
  0x12   : > { %s462_s21 = sshll.u32 %s701_s9, 11  ;;  %s435_s22 = sshll.u32 %s87_s20, 7 }
  0x13   : > { %s782_s25 = scalar_lea.hbm %s983_s0, %s462_s21  ;;  %s91_s26 = scalar_lea.vmem [#allocation2], %s435_s22 }
  0x14   : > { %s98_s27 = sshll.u32 %s91_s26, 4  ;;  %p786_p13 = pnand %p539_p10, %p758_p5  ;;  %s790_s27 = int_to_ptr.vmem [resolvable:$true] %s98_s27 }
  0x15   : > { %s792_s29 = scalar_lea.sflag [#allocation3], %s87_s20  ;;  %s609_s30 = scalar_lea.hbm %s782_s25, 2048 }
  0x16   : > { %p610_p0 = scmp.ne.s32.totalorder %s782_s25, %s609_s30  ;;  %p611_p1 = pneg %p786_p13 }
  0x17   : > { %s614_s4 = scalar_lea.hbm %s983_s0, 4096  ;;  %p615_p4 = scmp.lt.s32.totalorder %s782_s25, %s983_s0 }
  0x18   : > { %p612_p2 = pnand %p611_p1, %p610_p0  ;;  %p616_p5 = scmp.lt.s32.totalorder %s614_s4, %s609_s30 }
  0x1a   : > { %p613_p3 = pneg %p612_p2  ;;  %p617_p7 = por %p616_p5, %p615_p4 }
  0x1c   : > { %p618_p8 = pnand %p617_p7, %p613_p3 }
  0x1e   : > { %621 = shalt.err (!%p618_p8)
}
  0x1f   : > { %s622_s13 = scalar_lea.vmem %s790_s27, 2048  ;;  %s703_s14 = smov [#allocation2]  }
  0x20   : > { %p623_p10 = scmp.ne.s32.totalorder %s790_s27, %s622_s13  ;;  %s627_s16 = sshll.u32 %s703_s14, 4  ;;  %s628_s16 = int_to_ptr.vmem [resolvable:$false] %s627_s16 }
  0x21   : > { %s629_s20 = scalar_lea.vmem %s628_s16, 4096  ;;  %p630_p2 = scmp.lt.s32.totalorder %s790_s27, %s628_s16 }
  0x22   : > { %p625_p9 = pnand %p623_p10, %p611_p1  ;;  %p631_p12 = scmp.lt.s32.totalorder %s629_s20, %s622_s13 }
  0x24   : > { %p626_p0 = pneg %p625_p9  ;;  %p632_p11 = por %p631_p12, %p630_p2 }
  0x26   : > { %p633_p6 = pnand %p632_p11, %p626_p0 }
  0x28   : > { %636 = shalt.err (!%p633_p6)
}
  0x29   : > { %s704_s21 = smov 128   ;;  %s705_s22 = smov 8  }
  0x2a   : > { %534 = dma.hbm_to_vmem [thread:$0]  (!%p786_p13), %s782_s25, 2048, %s790_s27, %s792_s29, %s704_s21, %s704_s21, %s705_s22  }
  0x2b   : > { %p438_p9 = scmp.ge.s32.totalorder %s701_s9, 1  ;;  %p106_p1 = scmp.lt.s32.totalorder %s701_s9, 3 }
  0x2d   : > { %p107_p3 = pnand %p438_p9, %p106_p1 }
  0x2e   : > { %s816_s23 = sand.u32 (!%p107_p3), 1, %s693_s7   ;;  %p992_p6 = scmp.ne.s32.totalorder (!%p107_p3), %s988_s17, 0 }
  0x2f   : > { %110 = sbr.rel (%p107_p3) target bundleno = 259 (0x103), region = 24  ;;  %s439_s24 = sshll.u32 (!%p107_p3), %s816_s23, 7 }
  0x30   : > { %s113_s26 = scalar_lea.sflag (!%p107_p3), [#allocation3], %s816_s23  ;;  %s820_s30 = scalar_lea.vmem (!%p107_p3), [#allocation2], %s439_s24 }
  0x34   : > { %680 = dma.done.wait (%p992_p6), %s113_s26, 2048  }
  0x35   : > { %682 = vsyncadd (%p992_p6), %s113_s26, 4294965248  ;;  %v827_v0 = vld [vmem:[%s820_s30 + $0x10] sm:$0xff]  ;;  %v830_v1 = vld [vmem:[%s820_s30] sm:$0xff]  ;;  %s440_s17 = sshll.u32 %s816_s23, 6  ;;  %s479_s27 = sshll.u32 %s740_s10, 10 }
  0x36   : > { %v833_v2 = vld [vmem:[%s820_s30 + $0x18] sm:$0xff]  ;;  %v155_v3 = vmul.f32 %v827_v0, %v827_v0  ;;  %v153_v4 = vmul.f32 %v830_v1, %v830_v1  ;;  %v840_v5 = vld [vmem:[%s820_s30 + $0x8] sm:$0xff]  ;;  %v850_v9 = vld [vmem:[%s820_s30 + $0x20] sm:$0xff]  ;;  %s911_s25 = scalar_lea.vmem [#allocation5], %s440_s17  ;;  %s937_s3 = scalar_lea.hbm %s984_s1, %s479_s27 }
  0x37   : > { %v156_v6 = vmul.f32 %v833_v2, %v833_v2  ;;  %v154_v7 = vmul.f32 %v840_v5, %v840_v5  ;;  %v847_v8 = vld [vmem:[%s820_s30 + $0x28] sm:$0xff]  ;;  %v157_v11 = vmul.f32 %v850_v9, %v850_v9  ;;  %v857_v12 = vld [vmem:[%s820_s30 + $0x38] sm:$0xff]  ;;  %v860_v13 = vld [vmem:[%s820_s30 + $0x30] sm:$0xff]  ;;  %s359_s28 = sshll.u32 %s911_s25, 4  ;;  %s346_s4 = scalar_lea.sflag [#allocation4], %s816_s23  ;;  %s939_s28 = int_to_ptr.vmem [resolvable:$true] %s359_s28 }
  0x38   : > { %173 = vadd.xlane.f32.xlu1 %v155_v3  ;;  %169 = vadd.xlane.f32.xlu0 %v153_v4  ;;  %v158_v10 = vmul.f32 %v847_v8, %v847_v8  ;;  %v160_v14 = vmul.f32 %v857_v12, %v857_v12  ;;  %v159_v15 = vmul.f32 %v860_v13, %v860_v13  ;;  %v867_v16 = vld [vmem:[%s820_s30 + $0x48] sm:$0xff]  ;;  %v870_v17 = vld [vmem:[%s820_s30 + $0x40] sm:$0xff]  ;;  %v877_v20 = vld [vmem:[%s820_s30 + $0x58] sm:$0xff]  ;;  %s637_s10 = scalar_lea.vmem %s939_s28, 1024  ;;  %p993_p12 = scmp.ne.s32.totalorder %s989_s18, 0 }
  0x39   : > { %v162_v18 = vmul.f32 %v867_v16, %v867_v16  ;;  %v161_v19 = vmul.f32 %v870_v17, %v870_v17  ;;  %v880_v21 = vld [vmem:[%s820_s30 + $0x50] sm:$0xff]  ;;  %v164_v22 = vmul.f32 %v877_v20, %v877_v20  ;;  %v887_v24 = vld [vmem:[%s820_s30 + $0x68] sm:$0xff]  ;;  %v890_v25 = vld [vmem:[%s820_s30 + $0x60] sm:$0xff]  ;;  %p638_p11 = scmp.ne.s32.totalorder %s939_s28, %s637_s10  ;;  %s706_s5 = smov [#allocation5]  }
  0x3a   : > { %v163_v23 = vmul.f32 %v880_v21, %v880_v21  ;;  %v166_v26 = vmul.f32 %v887_v24, %v887_v24  ;;  %v165_v27 = vmul.f32 %v890_v25, %v890_v25  ;;  %v897_v28 = vld [vmem:[%s820_s30 + $0x78] sm:$0xff]  ;;  %v900_v29 = vld [vmem:[%s820_s30 + $0x70] sm:$0xff]  ;;  %s641_s11 = sshll.u32 %s706_s5, 4  ;;  %s642_s11 = int_to_ptr.vmem [resolvable:$false] %s641_s11 }
  0x3b   : > { %v168_v30 = vmul.f32 %v897_v28, %v897_v28  ;;  %v167_v31 = vmul.f32 %v900_v29, %v900_v29  ;;  %p639_p13 = pnand %p638_p11, %p993_p12  ;;  %s643_s13 = scalar_lea.vmem %s642_s11, 2048 }
  0x3c   : > { %175 = vadd.xlane.f32.xlu1 %v156_v6  ;;  %171 = vadd.xlane.f32.xlu0 %v154_v7  ;;  %p644_p5 = scmp.lt.s32.totalorder %s939_s28, %s642_s11  ;;  %p645_p7 = scmp.lt.s32.totalorder %s643_s13, %s637_s10 }
  0x3d   : > { %p640_p4 = pneg %p639_p13 }
  0x3e   : > { %p646_p8 = por %p645_p7, %p644_p5 }
  0x40   : > { %179 = vadd.xlane.f32.xlu1 %v158_v10  ;;  %177 = vadd.xlane.f32.xlu0 %v157_v11  ;;  %p647_p10 = pnand %p646_p8, %p640_p4 }
  0x44   : > { %183 = vadd.xlane.f32.xlu1 %v160_v14  ;;  %181 = vadd.xlane.f32.xlu0 %v159_v15 }
  0x48   : > { %187 = vadd.xlane.f32.xlu1 %v162_v18  ;;  %185 = vadd.xlane.f32.xlu0 %v161_v19 }
  0x4c   : > { %191 = vadd.xlane.f32.xlu1 %v164_v22  ;;  %189 = vadd.xlane.f32.xlu0 %v163_v23 }
  0x50   : > { %195 = vadd.xlane.f32.xlu1 %v166_v26  ;;  %193 = vadd.xlane.f32.xlu0 %v165_v27 }
  0x54   : > { %199 = vadd.xlane.f32.xlu1 %v168_v30  ;;  %197 = vadd.xlane.f32.xlu0 %v167_v31 }
  0xc1   : > { %v174_v32 = vpop.xlane.xlu1 %173  ;;  %v170_v33 = vpop.xlane.xlu0 %169 }
  0xc2   : > { %v203_v34 = vmax.f32 %v174_v32, 1e-24  ;;  %v201_v35 = vmax.f32 %v170_v33, 1e-24 }
  0xc4   : > { %577 = vrsqrt.f32 %v203_v34 }
  0xc5   : > { %579 = vrsqrt.f32 %v201_v35  ;;  %v176_v36 = vpop.xlane.xlu1 %175  ;;  %v172_v37 = vpop.xlane.xlu0 %171 }
  0xc6   : > { %v204_v38 = vmax.f32 %v176_v36, 1e-24  ;;  %v202_v39 = vmax.f32 %v172_v37, 1e-24 }
  0xc8   : > { %581 = vrsqrt.f32 %v204_v38 }
  0xc9   : > { %583 = vrsqrt.f32 %v202_v39  ;;  %v180_v40 = vpop.xlane.xlu1 %179  ;;  %v178_v41 = vpop.xlane.xlu0 %177 }
  0xca   : > { %v206_v42 = vmax.f32 %v180_v40, 1e-24  ;;  %v205_v43 = vmax.f32 %v178_v41, 1e-24 }
  0xcc   : > { %585 = vrsqrt.f32 %v206_v42 }
  0xcd   : > { %587 = vrsqrt.f32 %v205_v43  ;;  %v184_v44 = vpop.xlane.xlu1 %183  ;;  %v182_v45 = vpop.xlane.xlu0 %181 }
  0xce   : > { %v208_v46 = vmax.f32 %v184_v44, 1e-24  ;;  %v207_v47 = vmax.f32 %v182_v45, 1e-24 }
  0xd0   : > { %589 = vrsqrt.f32 %v208_v46 }
  0xd1   : > { %v578_v48 = vpop.eup %577  ;;  %591 = vrsqrt.f32 %v207_v47  ;;  %v188_v49 = vpop.xlane.xlu1 %187 }
  0xd2   : > { %v186_v50 = vpop.xlane.xlu0 %185  ;;  %v580_v51 = vpop.eup %579  ;;  %v210_v52 = vmax.f32 %v188_v49, 1e-24  ;;  %v235_v54 = vmul.f32 3.7796447, %v578_v48 }
  0xd3   : > { %v209_v53 = vmax.f32 %v186_v50, 1e-24  ;;  %v233_v56 = vmul.f32 3.7796447, %v580_v51 }
  0xd4   : > { %593 = vrsqrt.f32 %v210_v52  ;;  %v251_v3 = vmul.f32 %v235_v54, %v827_v0 }
  0xd5   : > { %v582_v55 = vpop.eup %581  ;;  %595 = vrsqrt.f32 %v209_v53  ;;  %v192_v57 = vpop.xlane.xlu1 %191  ;;  %v249_v7 = vmul.f32 %v233_v56, %v830_v1 }
  0xd6   : > { %v190_v58 = vpop.xlane.xlu0 %189  ;;  %v584_v59 = vpop.eup %583  ;;  %v236_v60 = vmul.f32 3.7796447, %v582_v55  ;;  %v212_v61 = vmax.f32 %v192_v57, 1e-24 }
  0xd7   : > { %v211_v62 = vmax.f32 %v190_v58, 1e-24  ;;  %v234_v63 = vmul.f32 3.7796447, %v584_v59 }
  0xd8   : > { %v252_v4 = vmul.f32 %v236_v60, %v833_v2  ;;  %597 = vrsqrt.f32 %v212_v61 }
  0xd9   : > { %v586_v6 = vpop.eup %585  ;;  %v250_v10 = vmul.f32 %v234_v63, %v840_v5  ;;  %599 = vrsqrt.f32 %v211_v62  ;;  %v196_v11 = vpop.xlane.xlu1 %195 }
  0xda   : > { %v194_v14 = vpop.xlane.xlu0 %193  ;;  %v588_v15 = vpop.eup %587  ;;  %v488_v18 = vpack.c.bf16 %v252_v4, %v251_v3  ;;  %v238_v19 = vmul.f32 3.7796447, %v586_v6  ;;  %v214_v22 = vmax.f32 %v196_v11, 1e-24 }
  0xdb   : > { %v213_v23 = vmax.f32 %v194_v14, 1e-24  ;;  %v483_v26 = vpack.c.bf16 %v250_v10, %v249_v7  ;;  %v237_v27 = vmul.f32 3.7796447, %v588_v15 }
  0xdc   : > { %520 = vst [vmem:[%s911_s25 + $0x8] sm:$0xff] %v488_v18   ;;  %v254_v0 = vmul.f32 %v238_v19, %v847_v8  ;;  %601 = vrsqrt.f32 %v214_v22 }
  0xdd   : > { %v590_v1 = vpop.eup %589  ;;  %484 = vst [vmem:[%s911_s25] sm:$0xff] %v483_v26   ;;  %v253_v2 = vmul.f32 %v237_v27, %v850_v9  ;;  %603 = vrsqrt.f32 %v213_v23  ;;  %v200_v5 = vpop.xlane.xlu1 %199 }
  0xde   : > { %v198_v30 = vpop.xlane.xlu0 %197  ;;  %v592_v31 = vpop.eup %591  ;;  %v240_v32 = vmul.f32 3.7796447, %v590_v1  ;;  %v216_v33 = vmax.f32 %v200_v5, 1e-24 }
  0xdf   : > { %v215_v34 = vmax.f32 %v198_v30, 1e-24  ;;  %v493_v35 = vpack.c.bf16 %v254_v0, %v253_v2  ;;  %v239_v36 = vmul.f32 3.7796447, %v592_v31 }
  0xe0   : > { %v256_v37 = vmul.f32 %v240_v32, %v857_v12  ;;  %605 = vrsqrt.f32 %v216_v33 }
  0xe1   : > { %v594_v8 = vpop.eup %593  ;;  %521 = vst [vmem:[%s911_s25 + $0x10] sm:$0xff] %v493_v35   ;;  %v255_v38 = vmul.f32 %v239_v36, %v860_v13  ;;  %607 = vrsqrt.f32 %v215_v34 }
  0xe2   : > { %v596_v9 = vpop.eup %595  ;;  %v242_v39 = vmul.f32 3.7796447, %v594_v8 }
  0xe3   : > { %v498_v40 = vpack.c.bf16 %v256_v37, %v255_v38  ;;  %v241_v41 = vmul.f32 3.7796447, %v596_v9 }
  0xe4   : > { %v258_v42 = vmul.f32 %v242_v39, %v867_v16 }
  0xe5   : > { %v598_v43 = vpop.eup %597  ;;  %522 = vst [vmem:[%s911_s25 + $0x18] sm:$0xff] %v498_v40   ;;  %v257_v44 = vmul.f32 %v241_v41, %v870_v17 }
  0xe6   : > { %v600_v45 = vpop.eup %599  ;;  %v244_v12 = vmul.f32 3.7796447, %v598_v43 }
  0xe7   : > { %v503_v46 = vpack.c.bf16 %v258_v42, %v257_v44  ;;  %v243_v47 = vmul.f32 3.7796447, %v600_v45 }
  0xe8   : > { %v260_v48 = vmul.f32 %v244_v12, %v877_v20 }
  0xe9   : > { %v602_v13 = vpop.eup %601  ;;  %523 = vst [vmem:[%s911_s25 + $0x20] sm:$0xff] %v503_v46   ;;  %v259_v49 = vmul.f32 %v243_v47, %v880_v21 }
  0xea   : > { %v604_v50 = vpop.eup %603  ;;  %v246_v16 = vmul.f32 3.7796447, %v602_v13 }
  0xeb   : > { %v508_v51 = vpack.c.bf16 %v260_v48, %v259_v49  ;;  %v245_v52 = vmul.f32 3.7796447, %v604_v50 }
  0xec   : > { %v262_v53 = vmul.f32 %v246_v16, %v887_v24 }
  0xed   : > { %v606_v17 = vpop.eup %605  ;;  %524 = vst [vmem:[%s911_s25 + $0x28] sm:$0xff] %v508_v51   ;;  %v261_v54 = vmul.f32 %v245_v52, %v890_v25 }
  0xee   : > { %v608_v20 = vpop.eup %607  ;;  %v248_v55 = vmul.f32 3.7796447, %v606_v17 }
  0xef   : > { %v513_v56 = vpack.c.bf16 %v262_v53, %v261_v54  ;;  %v247_v57 = vmul.f32 3.7796447, %v608_v20 }
  0xf0   : > { %v264_v21 = vmul.f32 %v248_v55, %v897_v28 }
  0xf1   : > { %525 = vst [vmem:[%s911_s25 + $0x30] sm:$0xff] %v513_v56   ;;  %v263_v58 = vmul.f32 %v247_v57, %v900_v29 }
  0xf3   : > { %v518_v24 = vpack.c.bf16 %v264_v21, %v263_v58 }
  0xf5   : > { %526 = vst [vmem:[%s911_s25 + $0x38] sm:$0xff] %v518_v24  }
  0xf6   : > { %650 = shalt.err (!%p647_p10)
}
  0xf7   : > { %s651_s14 = scalar_lea.hbm %s937_s3, 1024  ;;  %s655_s21 = scalar_lea.hbm %s984_s1, 2048 }
  0xf8   : > { %p652_p0 = scmp.ne.s32.totalorder %s937_s3, %s651_s14  ;;  %p656_p1 = scmp.lt.s32.totalorder %s937_s3, %s984_s1 }
  0xf9   : > { %p657_p3 = scmp.lt.s32.totalorder %s655_s21, %s651_s14 }
  0xfa   : > { %p653_p2 = pnand %p652_p0, %p993_p12 }
  0xfb   : > { %p658_p6 = por %p657_p3, %p656_p1 }
  0xfc   : > { %p654_p9 = pneg %p653_p2 }
  0xfe   : > { %p659_p11 = pnand %p658_p6, %p654_p9 }
 0x100   : > { %662 = shalt.err (!%p659_p11)
}
 0x101   : > { %s707_s26 = smov 64   ;;  %s708_s30 = smov 4  }
 0x102   : > { %529 = dma.vmem_to_hbm [thread:$0]  (%p993_p12), %s939_s28, 1024, %s937_s3, %s346_s4, %s707_s26, %s707_s26, %s708_s30  }
 0x103 PF: > { %s374_s17 = sand.u32 1, %s689_s6   ;;  %p994_p13 = scmp.ne.s32.totalorder %s990_s19, 0 }
 0x104   : > { %p995_p4 = scmp.ge.s32.totalorder %s701_s9, 2  ;;  %s375_s25 = scalar_lea.sflag [#allocation4], %s374_s17 }
 0x106   : > { %p536_p5 = pnand %p995_p4, %p994_p13 }
 0x108   : > { %p537_p7 = pneg %p536_p5 }
 0x10a   : > { %684 = dma.done.wait (%p537_p7), %s375_s25, 1024  }
 0x10b   : > { %686 = vsyncadd (%p537_p7), %s375_s25, 4294966272  ;;  %p14_p8 = scmp.ge.s32.totalorder %s744_s12, 4   ;;  %s996_s6 = smov %s693_s7 }
 0x10c   : > { %s997_s7 = smov %s697_s8  ;;  %s998_s8 = smov %s756_s15 }
 0x10d   : > { %s999_s9 = smov %s744_s12  ;;  %16 = sbr.rel (!%p14_p8) target bundleno = 5 (0x5), region = 69 }
 0x112   :  { %380 = vsyncpa [#allocation3], 1 }
 0x113   :  { %382 = vsyncpa [#allocation3 + $0x1], 1 }
 0x114   :  { %383 = vsyncpa [#allocation4], 1 }
 0x115   :  { %385 = vsyncpa [#allocation4 + $0x1], 1 }

</bundles_post_ra>
